<compile_context>
chip_gen: v7x
topology: tpu7x:2x2x1
jax: 0.10.0
libtpu: 0.0.40
codegen_flags: <defaults>
</compile_context>

<pallas_src>
import functools

import jax
import jax.numpy as jnp
from jax import lax
from jax.experimental import pallas as pl
from jax.experimental.pallas import tpu as pltpu


def _round_up(x, m):
    return ((x + m - 1) // m) * m


def _cdiv(a, b):
    return (a + b - 1) // b


def _perceptron_kernel(x_ref, wt_ref, b_ref, o_ref, *, apply_sigmoid: bool):
    # x_ref: (tb, F) native dtype; wt_ref: (F, O) f32; b_ref: (1, O) f32;
    # o_ref: (tb, O) f32.
    x = x_ref[...]
    if x.dtype != jnp.float32:
        # Only non-f32 inputs are promoted (module semantics: x_in.float()).
        x = x.astype(jnp.float32)
    y = jnp.dot(x, wt_ref[...], preferred_element_type=jnp.float32)
    y = y + b_ref[...]                      # (1, O) broadcasts over the tile
    if apply_sigmoid:
        y = jax.nn.sigmoid(y)
    o_ref[...] = y


def _choose_batch_tile(batch, num_features, x_itemsize, needs_cast):
    """Byte-budgeted batch tile. Returns (tile_rows, num_grid_steps)."""
    # VMEM bytes per batch row, per pipeline stage:
    per_row = num_features * x_itemsize            # native-dtype x block
    if needs_cast:
        per_row += num_features * 4                 # in-kernel f32 working copy
    per_row += 128 * 4                              # (tb, O) out block, O lane-padded to 128
    budget = 4 * 1024 * 1024                        # ~4 MiB/stage -> ~8 MiB double-buffered

    if batch * per_row <= budget:
        # Whole problem fits in one block: no pipeline overhead, no padding
        # (block dims equal the full array dims, so layout rules are trivially met).
        return batch, 1

    tb = max(32, (budget // per_row) // 32 * 32)    # 32-row multiple: safe for f32/bf16/int8
    n = _cdiv(batch, tb)
    if n % 2 == 1:
        # Even step count -> balanced split across v7x's two TensorCores.
        n += 1
        tb = max(32, _round_up(_cdiv(batch, n), 32))
        n = _cdiv(batch, tb)
    return tb, n


def perceptron_forward(loss_func, x_in, weight, bias, apply_sigmoid=False):
    """Mirrors Perceptron.forward.

    Args:
        loss_func: 'BCEWithLogitsLoss' (out_features=1, output squeezed) or
            anything else (out_features=2, output kept as (batch, 2)).
        x_in: (batch, num_features) array (any dtype; promoted to f32 in-kernel).
        weight: (out_features, num_features) f32 (PyTorch nn.Linear layout).
        bias: (out_features,) f32.
        apply_sigmoid: apply sigmoid inside the kernel.
    Returns:
        (batch,) for BCEWithLogitsLoss (after squeeze), else (batch, out_features).
    """
    batch, f = x_in.shape
    o = weight.shape[0]
    w_t = weight.astype(jnp.float32).T              # (F, O): tiny, transposed once outside
    bias2d = bias.reshape(1, o).astype(jnp.float32)

    itemsize = jnp.dtype(x_in.dtype).itemsize
    needs_cast = x_in.dtype != jnp.float32
    tb, n_steps = _choose_batch_tile(batch, f, itemsize, needs_cast)

    kernel = functools.partial(_perceptron_kernel, apply_sigmoid=apply_sigmoid)

    cost = pl.CostEstimate(
        flops=2 * batch * f * o,
        transcendentals=(batch * o) if apply_sigmoid else 0,
        bytes_accessed=batch * f * itemsize + f * o * 4 + o * 4 + batch * o * 4,
    )

    y = pl.pallas_call(
        kernel,
        out_shape=jax.ShapeDtypeStruct((batch, o), jnp.float32),
        grid=(n_steps,),
        in_specs=[
            pl.BlockSpec((tb, f), lambda i: (i, 0)),   # x: tiled over batch (ragged last block OK)
            pl.BlockSpec((f, o), lambda i: (0, 0)),    # W^T: constant block
            pl.BlockSpec((1, o), lambda i: (0, 0)),    # bias: constant block
        ],
        out_specs=pl.BlockSpec((tb, o), lambda i: (i, 0)),
        compiler_params=pltpu.CompilerParams(
            dimension_semantics=("parallel",),          # megacore sharding on v7x
            vmem_limit_bytes=32 * 1024 * 1024,          # raise v5e's 16 MiB default; fits v7x
        ),
        cost_estimate=cost,
    )(x_in, w_t, bias2d)

    if loss_func == 'BCEWithLogitsLoss':
        # torch .squeeze(): drops all size-1 dims (normally -> (batch,)).
        y = jnp.squeeze(y)
    return y


def init_perceptron_params(num_features, loss_func, key):
    """Deterministic init mimicking nn.Linear (uniform +-1/sqrt(fan_in))."""
    out_features = 1 if loss_func == 'BCEWithLogitsLoss' else 2
    kw, kb = jax.random.split(key)
    bound = 1.0 / jnp.sqrt(jnp.float32(num_features))
    weight = jax.random.uniform(
        kw, (out_features, num_features), jnp.float32, -bound, bound)
    bias = jax.random.uniform(
        kb, (out_features,), jnp.float32, -bound, bound)
    return weight, bias


if __name__ == "__main__":
    key = jax.random.PRNGKey(0)
    k_x, k_p1, k_p2, k_x3, k_p3, k_x4, k_p4 = jax.random.split(key, 7)
    HI = lax.Precision.HIGHEST

    batch, num_features = 8, 32
    x = jax.random.normal(k_x, (batch, num_features), jnp.float32)

    # Case 1: BCEWithLogitsLoss -> out_features=1, squeezed output, with sigmoid.
    loss_func = 'BCEWithLogitsLoss'
    w1, b1 = init_perceptron_params(num_features, loss_func, k_p1)
    y1 = perceptron_forward(loss_func, x, w1, b1, apply_sigmoid=True)
    jax.block_until_ready(y1)
    ref1 = jax.nn.sigmoid(jnp.squeeze(jnp.dot(x, w1.T, precision=HI) + b1))
    assert y1.shape == (batch,)
    assert jnp.allclose(y1, ref1, atol=1e-5, rtol=1e-5)

    # Case 2: CrossEntropyLoss-style -> out_features=2, logits, no sigmoid.
    loss_func = 'CrossEntropyLoss'
    w2, b2 = init_perceptron_params(num_features, loss_func, k_p2)
    y2 = perceptron_forward(loss_func, x, w2, b2, apply_sigmoid=False)
    jax.block_until_ready(y2)
    ref2 = jnp.dot(x, w2.T, precision=HI) + b2
    assert y2.shape == (batch, 2)
    assert jnp.allclose(y2, ref2, atol=1e-5, rtol=1e-5)

    # Case 3: bf16 input (halved HBM read bytes), non-multiple-of-8 batch,
    # single full-array block (fits the byte budget -> grid=(1,), no padding).
    batch3, feat3 = 1000, 128
    x3 = jax.random.normal(k_x3, (batch3, feat3), jnp.float32).astype(jnp.bfloat16)
    w3, b3 = init_perceptron_params(feat3, 'CrossEntropyLoss', k_p3)
    y3 = perceptron_forward('CrossEntropyLoss', x3, w3, b3, apply_sigmoid=False)
    jax.block_until_ready(y3)
    ref3 = jnp.dot(x3.astype(jnp.float32), w3.T, precision=HI) + b3
    assert y3.shape == (batch3, 2)
    assert jnp.allclose(y3, ref3, atol=1e-4, rtol=1e-4)

    # Case 4: larger batch -> exercises the multi-step byte-budgeted grid with
    # an even step count and a ragged (masked) last block, no wrapper pad.
    batch4, feat4 = 9000, 128
    x4 = jax.random.normal(k_x4, (batch4, feat4), jnp.float32)
    w4, b4 = init_perceptron_params(feat4, 'BCEWithLogitsLoss', k_p4)
    y4 = perceptron_forward('BCEWithLogitsLoss', x4, w4, b4, apply_sigmoid=True)
    jax.block_until_ready(y4)
    ref4 = jax.nn.sigmoid(jnp.squeeze(jnp.dot(x4, w4.T, precision=HI) + b4))
    assert y4.shape == (batch4,)
    assert jnp.allclose(y4, ref4, atol=1e-5, rtol=1e-5)

    print("KERNEL_OK")
</pallas_src>

<mosaic_0001>
module attributes {stable_mosaic.version = 11 : i64} {
  func.func @_perceptron_kernel(%arg0: i32, %arg1: memref<8x32xf32, #tpu.memory_space<vmem>>, %arg2: memref<32x1xf32, #tpu.memory_space<vmem>>, %arg3: memref<1x1xf32, #tpu.memory_space<vmem>>, %arg4: memref<8x1xf32, #tpu.memory_space<vmem>>) attributes {dimension_semantics = [#tpu.dimension_semantics<parallel>], iteration_bounds = array<i64: 1>, scalar_prefetch = 0 : i64, scratch_operands = 0 : i64, tpu.core_type = #tpu.core_type<tc>, window_params = [{transform_indices = @transform_0, window_bounds = array<i64: 8, 32>}, {pipeline_mode = #tpu.pipeline_mode<synchronous>, transform_indices = @transform_1, window_bounds = array<i64: 32, 1>}, {pipeline_mode = #tpu.pipeline_mode<synchronous>, transform_indices = @transform_2, window_bounds = array<i64: 1, 1>}, {transform_indices = @transform_3, window_bounds = array<i64: 8, 1>}]} {
    %c0 = arith.constant 0 : index
    %c0_0 = arith.constant 0 : index
    %0 = vector.load %arg1[%c0, %c0_0] : memref<8x32xf32, #tpu.memory_space<vmem>>, vector<8x32xf32>
    %c0_1 = arith.constant 0 : index
    %c0_2 = arith.constant 0 : index
    %1 = vector.load %arg2[%c0_1, %c0_2] : memref<32x1xf32, #tpu.memory_space<vmem>>, vector<32x1xf32>
    %cst = arith.constant dense<0.000000e+00> : vector<8x1xf32>
    %2 = tpu.matmul %0, %1, %cst {dimension_numbers = #tpu.dot_dimension_numbers<[1], [0], [0], [1], [0, 0, 1, 1], [], []>} : vector<8x32xf32>, vector<32x1xf32>, vector<8x1xf32> -> vector<8x1xf32>
    %c0_3 = arith.constant 0 : index
    %c0_4 = arith.constant 0 : index
    %3 = vector.load %arg3[%c0_3, %c0_4] : memref<1x1xf32, #tpu.memory_space<vmem>>, vector<1x1xf32>
    %4 = vector.broadcast %3 : vector<1x1xf32> to vector<8x1xf32>
    %5 = arith.addf %2, %4 : vector<8x1xf32>
    %6 = arith.negf %5 : vector<8x1xf32>
    %7 = math.exp %6 : vector<8x1xf32>
    %cst_5 = arith.constant 1.000000e+00 : f32
    %8 = vector.broadcast %cst_5 : f32 to vector<8x1xf32>
    %9 = arith.addf %8, %7 : vector<8x1xf32>
    %10 = arith.divf %8, %9 : vector<8x1xf32>
    %c0_6 = arith.constant 0 : index
    %c0_7 = arith.constant 0 : index
    %11 = vector.load %arg4[%c0_6, %c0_7] : memref<8x1xf32, #tpu.memory_space<vmem>>, vector<8x1xf32>
    tpu.vector_store %arg4[%c0_6, %c0_7], %10 {strides = array<i32>} : memref<8x1xf32, #tpu.memory_space<vmem>>, vector<8x1xf32>,
    return
  }
  func.func @transform_0(%arg0: i32) -> (i32, i32) {
    %c0_i32 = arith.constant 0 : i32
    %c0_i32_0 = arith.constant 0 : i32
    return %arg0, %c0_i32 : i32, i32
  }
  func.func @transform_1(%arg0: i32) -> (i32, i32) {
    %c0_i32 = arith.constant 0 : i32
    %c0_i32_0 = arith.constant 0 : i32
    %c0_i32_1 = arith.constant 0 : i32
    return %c0_i32, %c0_i32_0 : i32, i32
  }
  func.func @transform_2(%arg0: i32) -> (i32, i32) {
    %c0_i32 = arith.constant 0 : i32
    %c0_i32_0 = arith.constant 0 : i32
    %c0_i32_1 = arith.constant 0 : i32
    return %c0_i32, %c0_i32_0 : i32, i32
  }
  func.func @transform_3(%arg0: i32) -> (i32, i32) {
    %c0_i32 = arith.constant 0 : i32
    %c0_i32_0 = arith.constant 0 : i32
    return %arg0, %c0_i32 : i32, i32
  }
}

</mosaic_0001>

<bundles_post_ra>
// kernel: tpu_custom_call.1
= control target key start
LH: loop header
LB: loop body
LE: loop exit
PB: predicated region body
PF: predicated region fallthrough
CT: control target
= control target key end

     0   :  { %v146_v0 = vmov 0.0|0.0   ;;  %vm147_vm0 = vmmov 0   ;;  %v148_v4 = vmov 0.0   ;;  %vm28_vm1 = vcmask 261120   ;;  %s190_s1 = inlined_call_operand.vmem [shape: f32[32,1], index: 1, kind: input, shape index: {}]   ;;  %s191_s2 = inlined_call_operand.<no memory space> [shape: f32[1,1], index: 2, kind: input, shape index: {}]   ;;  %s192_s0 = inlined_call_operand.vmem [shape: f32[8,32], index: 0, kind: input, shape index: {}]   ;;  %s193_s3 = inlined_call_operand.vmem [shape: f32[8,1], index: 3, kind: output, shape index: {}]  }
   0x1   :  { %133 = vmatprep.subr.bf16.mxu0 %v146_v0  ;;  %v17_v1 = vld [vmem:[%s190_s1] sm:$0xff]  ;;  %v18_v2 = vld [vmem:[%s190_s1 + $0x8] sm:$0xff]  ;;  %v19_v3 = vld [vmem:[%s190_s1 + $0x10] sm:$0xff]  ;;  %130 = vmatprep.mubr.msk.f32.mxu0 %vm147_vm0, %v148_v4  ;;  %v8_v5 = vstv %s191_s2  ;;  %vm108_vm2 = vcmask 7168  }
   0x2   :  { %v134_v6 = vpack.c.bf16 %v18_v2, %v17_v1  ;;  %v20_v7 = vld [vmem:[%s190_s1 + $0x18] sm:$0xff]  ;;  %9 = vst [vmem:[#allocation2] sm:$0x1] %v8_v5  ;;  %v16_v9 = vld [vmem:[%s192_s0] sm:$0xff] }
   0x3   :  { %v137_v8 = vpack.c.bf16 %v20_v7, %v19_v3 }
   0x4   :  { %135 = vmatpush3.bf16.msra.mxu0 %v134_v6 }
   0x5   :  { %136 = vmatprep.subr.bf16.mxu0 %v146_v0 }
   0x8   :  { %138 = vmatpush3.bf16.msra.mxu0 %v137_v8 }
   0x9   :  { %v114_v10 = vld [vmem:[#allocation2] ss:$0 sm:$0xff] }
   0xb   :  { %131 = vmatmul.mubr.msk.f32.vlgmr.msra.gmra.mrb[0].mxu0 %vm28_vm1, %v16_v9 }
  0xde   :  { %v98_v11 = vpop.f32.mrb[0].mxu0 }
  0xdf   :  { %v99_v12 = vadd.f32 %v114_v10, %v98_v11  ;;  %v132_v13 = vpop.f32.mrb[1].mxu0 }
  0xe1   :  { %v116_v14 = vmul.f32 -1.442695, %v99_v12 }
  0xe3   :  { %142 = vpow2.f32 %v116_v14 }
  0xed   :  { %v143_v15 = vpop.eup %142 }
  0xee   :  { %v105_v16 = vadd.f32 1.0, %v143_v15 }
  0xf0   :  { %144 = vrcp.f32 %v105_v16 }
  0xfa   :  { %v145_v17 = vpop.eup %144 }
  0xfb   :  { %109 = vst.msk [vmem:[%s193_s3] sm:$0xff] %vm108_vm2, %v145_v17 }

</bundles_post_ra>
